<compile_context>
chip_gen: v7x
topology: tpu7x:2x2x1
jax: 0.10.0
libtpu: 0.0.40
codegen_flags: <defaults>
</compile_context>

<pallas_src>
import functools

import numpy as np
import jax
import jax.numpy as jnp
from jax import lax
from jax.experimental import pallas as pl
from jax.experimental.pallas import tpu as pltpu

_VMEM_LIMIT = 48 * 1024 * 1024   # scoped VMEM handed to Mosaic (v7x-safe)
_VMEM_BUDGET = 40 * 1024 * 1024  # what we allow the tile working set to use


def _round_up(a, b):
    return (a + b - 1) // b * b


def _cdiv(a, b):
    return (a + b - 1) // b


def _largest_dividing_tile(kp, tk_max):
    """Largest multiple of 128 that divides kp and is <= tk_max (>= 128)."""
    best, t = 128, 128
    while t <= min(tk_max, kp):
        if kp % t == 0:
            best = t
        t += 128
    return min(best, kp)


# ---------------------------------------------------------------------------
# Kernels
# ---------------------------------------------------------------------------
def _single_k_kernel(x_ref, w_ref, b_ref, o_ref, *, mxu_dtype, precision):
    """One (tm, tn) output tile; full K slab resident -> no accumulator pass."""
    acc = jnp.dot(
        x_ref[...].astype(mxu_dtype),
        w_ref[...].astype(mxu_dtype),
        preferred_element_type=jnp.float32,
        precision=precision,
    )
    o_ref[...] = (acc + b_ref[...]).astype(o_ref.dtype)


def _multi_k_kernel(x_ref, w_ref, b_ref, o_ref, acc_ref, *, mxu_dtype, precision):
    """Fallback for very large inp_dim: accumulate over the K grid axis."""
    k = pl.program_id(2)

    @pl.when(k == 0)
    def _():
        acc_ref[...] = jnp.zeros_like(acc_ref)

    acc_ref[...] += jnp.dot(
        x_ref[...].astype(mxu_dtype),
        w_ref[...].astype(mxu_dtype),
        preferred_element_type=jnp.float32,
        precision=precision,
    )

    @pl.when(k == pl.num_programs(2) - 1)
    def _():
        o_ref[...] = (acc_ref[...] + b_ref[...]).astype(o_ref.dtype)


# ---------------------------------------------------------------------------
# Wrapper
# ---------------------------------------------------------------------------
def sparse_input_linear(x, w, b, *, exact=False, tm=512, tk=None):
    """SparseInputLinear.forward: y = x @ w + b.

    exact=False (default): bf16 MXU operands (cast per-tile in VMEM), f32 accum.
    exact=True: f32 operands with per-dot HIGHEST precision (numerics checks).
    """
    m, kdim = x.shape
    kdim2, n = w.shape
    assert kdim == kdim2 and b.shape == (n,)

    if exact:
        mxu_dtype, precision = jnp.float32, lax.Precision.HIGHEST
    else:
        mxu_dtype, precision = jnp.bfloat16, None

    itemsize = max(jnp.dtype(x.dtype).itemsize, jnp.dtype(w.dtype).itemsize)

    # --- N: out_dim is small for this module; one lane-dense tile covers it.
    np_ = _round_up(n, 128)
    if np_ <= 2048:
        tn = np_
    else:
        tn = 1024
        np_ = _round_up(n, tn)
    n_grid = np_ // tn

    # --- K: pad x only to (., 128) granularity, and only if inp_dim is ragged.
    #     No tm/tk-multiple padding, no M padding.
    # TODO(synk): an in-kernel broadcasted_iota mask on the last K block would
    # avoid even this one extra pass over x when inp_dim % 128 != 0.
    kp = kdim if kdim % 128 == 0 else _round_up(kdim, 128)
    xp = x if kp == kdim else jnp.pad(x, ((0, 0), (0, kp - kdim)))
    wp = w if (kp == kdim and np_ == n) else jnp.pad(
        w, ((0, kp - kdim), (0, np_ - n)))
    bp = (b if np_ == n else jnp.pad(b, (0, np_ - n))).reshape(1, np_)

    # --- M: big tiles, but keep the M grid >= 2 so both v7x TensorCores engage.
    tm = min(tm, _round_up(m, 8))
    if _cdiv(m, tm) < 2 and m > 16:
        tm = max(8, _round_up(_cdiv(m, 2), 8))

    # --- VMEM working-set budget (x2 for double buffering).
    def fits(tm_, tk_):
        return 2 * (tm_ * tk_ + tk_ * tn + tm_ * tn) * itemsize <= _VMEM_BUDGET

    use_single_k = tk is None and fits(tm, kp)
    if tk is None and not use_single_k:
        # Try shrinking the M tile before giving up on the resident-K layout.
        tm_try = tm
        while tm_try > 64 and not fits(tm_try, kp):
            tm_try = max(64, _round_up(tm_try // 2, 8))
        if fits(tm_try, kp):
            tm, use_single_k = tm_try, True

    m_grid = _cdiv(m, tm)
    out_shape = jax.ShapeDtypeStruct((m, np_), x.dtype)

    if use_single_k:
        kernel = functools.partial(
            _single_k_kernel, mxu_dtype=mxu_dtype, precision=precision)
        out = pl.pallas_call(
            kernel,
            out_shape=out_shape,
            grid_spec=pltpu.PrefetchScalarGridSpec(
                num_scalar_prefetch=0,
                grid=(m_grid, n_grid),
                in_specs=[
                    pl.BlockSpec((tm, kp), lambda i, j: (i, 0)),
                    pl.BlockSpec((kp, tn), lambda i, j: (0, j)),
                    pl.BlockSpec((1, tn), lambda i, j: (0, j)),
                ],
                out_specs=pl.BlockSpec((tm, tn), lambda i, j: (i, j)),
            ),
            compiler_params=pltpu.CompilerParams(
                dimension_semantics=("parallel", "parallel"),
                vmem_limit_bytes=_VMEM_LIMIT,
            ),
        )(xp, wp, bp)
    else:
        if tk is not None:
            tk_eff = max(128, (tk // 128) * 128)
        else:
            avail = _VMEM_BUDGET // (2 * itemsize) - tm * tn
            tk_eff = max(128, (avail // (tm + tn)) // 128 * 128)
        # tk must evenly cover kp so no unspecified OOB data enters the sum.
        tk_eff = _largest_dividing_tile(kp, tk_eff)
        kernel = functools.partial(
            _multi_k_kernel, mxu_dtype=mxu_dtype, precision=precision)
        out = pl.pallas_call(
            kernel,
            out_shape=out_shape,
            grid_spec=pltpu.PrefetchScalarGridSpec(
                num_scalar_prefetch=0,
                grid=(m_grid, n_grid, kp // tk_eff),
                in_specs=[
                    pl.BlockSpec((tm, tk_eff), lambda i, j, k: (i, k)),
                    pl.BlockSpec((tk_eff, tn), lambda i, j, k: (k, j)),
                    pl.BlockSpec((1, tn), lambda i, j, k: (0, j)),
                ],
                out_specs=pl.BlockSpec((tm, tn), lambda i, j, k: (i, j)),
                scratch_shapes=[pltpu.VMEM((tm, tn), jnp.float32)],
            ),
            compiler_params=pltpu.CompilerParams(
                dimension_semantics=("parallel", "parallel", "arbitrary"),
                vmem_limit_bytes=_VMEM_LIMIT,
            ),
        )(xp, wp, bp)

    return out if np_ == n else out[:, :n]


if __name__ == "__main__":
    # Shapes consistent with the module: x is (num_rows, inp_dim).
    num_rows, inp_dim, out_dim = 200, 300, 48
    stdv = 1.0 / np.sqrt(out_dim)

    key = jax.random.PRNGKey(0)
    kx, kw, kb, kx2, kw2 = jax.random.split(key, 5)
    # reset_parameters(): uniform(-stdv, stdv) for weight and bias.
    w = jax.random.uniform(kw, (inp_dim, out_dim), jnp.float32, -stdv, stdv)
    b = jax.random.uniform(kb, (out_dim,), jnp.float32, -stdv, stdv)
    x = jax.random.normal(kx, (num_rows, inp_dim), jnp.float32)

    # Host float64 reference (avoids any TPU matmul-precision ambiguity).
    ref = (np.asarray(x, np.float64) @ np.asarray(w, np.float64)
           + np.asarray(b, np.float64))

    def check(out, ref_, tol):
        out = np.asarray(jax.block_until_ready(out), np.float64)
        assert out.shape == ref_.shape
        assert np.all(np.isfinite(out))
        assert np.allclose(out, ref_, rtol=tol, atol=tol), \
            float(np.abs(out - ref_).max())

    # 1) Default fast path: bf16 MXU operands, f32 accumulation, resident-K slab.
    check(sparse_input_linear(x, w, b), ref, 5e-2)
    # 2) Exact-f32 path (per-dot HIGHEST precision, no global config flip).
    check(sparse_input_linear(x, w, b, exact=True), ref, 1e-4)
    # 3) Forced multi-K accumulator fallback path (grid (2, 1, 3)).
    check(sparse_input_linear(x, w, b, exact=True, tm=128, tk=128), ref, 1e-4)

    # 4) 128-aligned inp_dim: zero-copy path (no padding of x at all).
    x2 = jax.random.normal(kx2, (num_rows, 384), jnp.float32)
    w2 = jax.random.uniform(kw2, (384, out_dim), jnp.float32, -stdv, stdv)
    ref2 = (np.asarray(x2, np.float64) @ np.asarray(w2, np.float64)
            + np.asarray(b, np.float64))
    check(sparse_input_linear(x2, w2, b, exact=True), ref2, 1e-4)

    print("KERNEL_OK")
</pallas_src>

<mosaic_0001>
module attributes {stable_mosaic.version = 11 : i64} {
  func.func @_single_k_kernel(%arg0: i32, %arg1: i32, %arg2: memref<104x384xf32, #tpu.memory_space<vmem>>, %arg3: memref<384x128xf32, #tpu.memory_space<vmem>>, %arg4: memref<1x128xf32, #tpu.memory_space<vmem>>, %arg5: memref<104x128xf32, #tpu.memory_space<vmem>>) attributes {dimension_semantics = [#tpu.dimension_semantics<parallel>, #tpu.dimension_semantics<parallel>], iteration_bounds = array<i64: 2, 1>, scalar_prefetch = 0 : i64, scratch_operands = 0 : i64, tpu.core_type = #tpu.core_type<tc>, window_params = [{transform_indices = @transform_0, window_bounds = array<i64: 104, 384>}, {transform_indices = @transform_1, window_bounds = array<i64: 384, 128>}, {transform_indices = @transform_2, window_bounds = array<i64: 1, 128>}, {transform_indices = @transform_3, window_bounds = array<i64: 104, 128>}]} {
    %c0 = arith.constant 0 : index
    %c0_0 = arith.constant 0 : index
    %0 = vector.load %arg2[%c0, %c0_0] : memref<104x384xf32, #tpu.memory_space<vmem>>, vector<104x384xf32>
    %1 = arith.truncf %0 : vector<104x384xf32> to vector<104x384xbf16>
    %c0_1 = arith.constant 0 : index
    %c0_2 = arith.constant 0 : index
    %2 = vector.load %arg3[%c0_1, %c0_2] : memref<384x128xf32, #tpu.memory_space<vmem>>, vector<384x128xf32>
    %3 = arith.truncf %2 : vector<384x128xf32> to vector<384x128xbf16>
    %cst = arith.constant dense<0.000000e+00> : vector<104x128xf32>
    %4 = tpu.matmul %1, %3, %cst {dimension_numbers = #tpu.dot_dimension_numbers<[1], [0], [0], [1], [0, 0, 1, 1], [], []>} : vector<104x384xbf16>, vector<384x128xbf16>, vector<104x128xf32> -> vector<104x128xf32>
    %c0_3 = arith.constant 0 : index
    %c0_4 = arith.constant 0 : index
    %5 = vector.load %arg4[%c0_3, %c0_4] : memref<1x128xf32, #tpu.memory_space<vmem>>, vector<1x128xf32>
    %6 = vector.broadcast %5 : vector<1x128xf32> to vector<104x128xf32>
    %7 = arith.addf %4, %6 : vector<104x128xf32>
    %c0_5 = arith.constant 0 : index
    %c0_6 = arith.constant 0 : index
    %8 = vector.load %arg5[%c0_5, %c0_6] : memref<104x128xf32, #tpu.memory_space<vmem>>, vector<104x128xf32>
    tpu.vector_store %arg5[%c0_5, %c0_6], %7 {strides = array<i32>} : memref<104x128xf32, #tpu.memory_space<vmem>>, vector<104x128xf32>,
    return
  }
  func.func @transform_0(%arg0: i32, %arg1: i32) -> (i32, i32) {
    %c0_i32 = arith.constant 0 : i32
    %c0_i32_0 = arith.constant 0 : i32
    return %arg0, %c0_i32 : i32, i32
  }
  func.func @transform_1(%arg0: i32, %arg1: i32) -> (i32, i32) {
    %c0_i32 = arith.constant 0 : i32
    %c0_i32_0 = arith.constant 0 : i32
    return %c0_i32, %arg1 : i32, i32
  }
  func.func @transform_2(%arg0: i32, %arg1: i32) -> (i32, i32) {
    %c0_i32 = arith.constant 0 : i32
    %c0_i32_0 = arith.constant 0 : i32
    return %c0_i32, %arg1 : i32, i32
  }
  func.func @transform_3(%arg0: i32, %arg1: i32) -> (i32, i32) {
    %c0_i32 = arith.constant 0 : i32
    return %arg0, %arg1 : i32, i32
  }
}

</mosaic_0001>

<bundles_post_ra>
// kernel: tpu_custom_call.1
= control target key start
LH: loop header
LB: loop body
LE: loop exit
PB: predicated region body
PF: predicated region fallthrough
CT: control target
= control target key end

     0   :  { %8 = vsyncpa [#allocation3], 0  ;;  %s1433_s0 = inlined_call_operand.hbm [shape: f32[200,384], index: 0, kind: input, shape index: {}]   ;;  %s1434_s1 = inlined_call_operand.hbm [shape: f32[384,128], index: 1, kind: input, shape index: {}]   ;;  %s1435_s2 = inlined_call_operand.vmem [shape: f32[1,128], index: 2, kind: input, shape index: {}]   ;;  %s1436_s3 = inlined_call_operand.hbm [shape: f32[200,128], index: 3, kind: output, shape index: {}]  }
   0x1   :  { %10 = vsyncpa [#allocation3 + $0x1], 0 }
   0x2   :  { %11 = vsyncpa [#allocation6], 0 }
   0x3   :  { %12 = vsyncpa [#allocation4], 0 }
   0x4   :  { %14 = vsyncpa [#allocation4 + $0x1], 0  ;;  %s1108_s12 = smov 0   ;;  %s1110_s13 = smov 0  }
   0x5   :  { %s1112_s14 = smov 0   ;;  %s1114_s15 = smov 0  }
   0x6   :  { %s1116_s16 = smov 0   ;;  %s1118_s17 = smov 0  }
   0x7 LB: > { %s715_s18 = sadd.s32 4294967295, %s1075_s17   ;;  %s716_s19 = sadd.s32 4294967294, %s1075_s17   ;;  %s1075_s17 = sphi %s1118_s17, %s20_s17   ;;  %s1071_s16 = sphi %s1116_s16, %s1458_s16   ;;  %s1067_s15 = sphi %s1114_s15, %s1457_s15   ;;  %s1063_s14 = sphi %s1112_s14, %s1456_s14   ;;  %s1059_s13 = sphi %s1110_s13, %s1455_s13   ;;  %s1055_s12 = sphi %s1108_s12, %s1454_s12  }
   0x8   : > { %s32_s20 = sadd.s32 1, %s1071_s16  ;;  %s39_s21 = sadd.s32 1, %s1063_s14 }
   0x9   : > { %p34_p0 = scmp.ge.s32.totalorder %s32_s20, 2  ;;  %p46_p1 = scmp.ne.s32.totalorder %s1063_s14, %s1059_s13 }
   0xa   : > { %p47_p2 = scmp.eq.s32.totalorder %s1075_s17, 0  ;;  %p52_p3 = scmp.ne.s32.totalorder %s1059_s13, %s1055_s12 }
   0xb   : > { %s1460_s20 = smov (%p34_p0, %s32_s20), 0  ;;  %p1153_p5 = scmp.eq.s32.totalorder %s715_s18, 0 }
   0xc   : > { %p1149_p4 = por %p47_p2, %p46_p1  ;;  %s36_s24 = ssub.s32 %s1071_s16, %s1460_s20 }
   0xd   : > { %s1442_s23 = scalar_select %p1153_p5, 1, 0 }
   0xe   : > { %s1441_s22 = scalar_select %p1149_p4, 1, 0 }
   0xf   : > { %p130_p6 = scmp.eq.s32.totalorder %s715_s18, 1  ;;  %p37_p7 = scmp.eq.s32.totalorder %s36_s24, 0 }
  0x10   : > { %p1161_p8 = por %p1153_p5, %p52_p3  ;;  %p136_p10 = scmp.eq.s32.totalorder %s716_s19, 1 }
  0x11   : > { %p1165_p9 = por %p130_p6, %p46_p1  ;;  %p717_p12 = scmp.ge.s32.totalorder %s1075_s17, 1 }
  0x12   : > { %s1443_s25 = scalar_select %p1161_p8, 1, 0 }
  0x13   : > { %s1444_s26 = scalar_select %p1165_p9, 1, 0 }
  0x14   : > { %s1170_s27 = scalar_select %p37_p7, %s1063_s14, %s39_s21  }
  0x15   : > { %p1172_p11 = por %p136_p10, %p52_p3  ;;  %p143_p13 = scmp.lt.s32.totalorder %s1075_s17, 3 }
  0x16   : > { %s1077_s30 = smov [#allocation5]   ;;  %s933_s8 = scalar_lea.hbm %s1434_s1, 6144 }
  0x17   : > { %s1445_s28 = scalar_select %p1172_p11, 1, 0 }
  0x18   : > { %p1178_p0 = pnand %p717_p12, %p143_p13  ;;  %s157_s4 = sshll.u32 %s1077_s30, 4  ;;  %s158_s4 = int_to_ptr.vmem [resolvable:$true] %s157_s4 }
  0x19   : > { %p934_p3 = scmp.ne.s32.totalorder %s1434_s1, %s933_s8  ;;  %p940_p12 = scmp.lt.u32.totalorder %s933_s8, %s1434_s1 }
  0x1a   : > { %s1446_s29 = scalar_select %p1178_p0, 1, 0 }
  0x1b   : > { %p864_p1 = pneg %p1178_p0 }
  0x1d   : > { %p1186_p2 = pnand %p864_p1, %p1153_p5 }
  0x1f   : > { %p935_p6 = pneg %p1186_p2 }
  0x21   : > { %p936_p7 = pnand %p935_p6, %p934_p3 }
  0x23   : > { %p937_p10 = pneg %p936_p7 }
  0x25   : > { %p942_p13 = pnand %p940_p12, %p937_p10 }
  0x27   : > { %945 = shalt.err (!%p942_p13)
}
  0x28   : > { %s946_s19 = scalar_lea.vmem %s158_s4, 6144  ;;  %p954_p5 = scmp.lt.s32.totalorder %s158_s4, %s158_s4 }
  0x29   : > { %p947_p1 = scmp.ne.s32.totalorder %s158_s4, %s946_s19  ;;  %p955_p8 = scmp.lt.s32.totalorder %s946_s19, %s946_s19 }
  0x2b   : > { %p949_p11 = pnand %p947_p1, %p935_p6  ;;  %p956_p0 = por %p955_p8, %p954_p5 }
  0x2d   : > { %p950_p9 = pneg %p949_p11 }
  0x2f   : > { %p957_p4 = pnand %p956_p0, %p950_p9 }
  0x31   : > { %960 = shalt.err (!%p957_p4)
}
  0x32   : > { %s1078_s21 = smov 128   ;;  %s1079_s24 = smov 8  }
  0x33   : > { %867 = dma.hbm_to_vmem [thread:$0]  (!%p1186_p2), %s1434_s1, 6144, %s158_s4, [#allocation6], %s1078_s21, %s1078_s21, %s1079_s24  }
  0x34   : > { %p720_p3 = scmp.ge.s32.totalorder %s1075_s17, 2 }
  0x35   : > { %p1448_p11 = scmp.ne.s32.totalorder (!%p720_p3), %s1441_s22, 0 }
  0x36   : > { %173 = sbr.rel (%p720_p3) target bundleno = 97 (0x61), region = 24 }
  0x3d   : > { %176 = sbr.rel (!%p1448_p11) target bundleno = 97 (0x61), region = 28  ;;  %s177_s7 = sand.u32 (%p1448_p11), 1, %s1063_s14  }
  0x3e   : > { %s182_s8 = smul.u32 (%p1448_p11), 13, %s1071_s16  ;;  %s1216_s11 = scalar_lea.sflag (%p1448_p11), [#allocation3], %s177_s7 }
  0x3f   : > { %s854_s9 = smul.u32 (%p1448_p11), 312, %s177_s7 }
  0x40   : > { %s183_s10 = ssub.s32 (%p1448_p11), 25, %s182_s8 }
  0x41   : > { %p184_p4 = scmp.lt.s32.totalorder (%p1448_p11), %s183_s10, 13  ;;  %s181_s18 = scalar_lea.vmem (%p1448_p11), [#allocation2], %s854_s9 }
  0x44   : > { %s1462_s10 = smov (!%p184_p4, %s183_s10), 13 }
  0x45   : > { %s1213_s5 = smul.u32 384, %s1462_s10 }
  0x47   : > { %s189_s4 = ssub.s32 4992, %s1213_s5 }
  0x48   : > { %190 = vsyncadd %s1216_s11, %s189_s4  ;;  %p723_p5 = scmp.ne.s32.totalorder %s1213_s5, 0  ;;  %s873_s22 = smul.u32 4992, %s1071_s16 }
  0x49   : > { %s196_s19 = sshll.u32 %s181_s18, 4  ;;  %s965_s9 = scalar_lea.hbm %s1433_s0, 9600  ;;  %s1226_s19 = int_to_ptr.vmem [resolvable:$true] %s196_s19 }
  0x4a   : > { %s1224_s30 = scalar_lea.hbm %s1433_s0, %s873_s22 }
  0x4b   : > { %s961_s6 = scalar_lea.hbm %s1224_s30, %s1213_s5  ;;  %p966_p2 = scmp.lt.u32.totalorder %s1224_s30, %s1433_s0 }
  0x4c   : > { %p962_p8 = scmp.ne.s32.totalorder %s1224_s30, %s961_s6  ;;  %p967_p6 = scmp.lt.u32.totalorder %s965_s9, %s961_s6 }
  0x4d   : > { %p969_p10 = scmp.lt.u32.totalorder %s961_s6, %s1224_s30 }
  0x4e   : > { %p963_p9 = pnand %p962_p8, %p723_p5  ;;  %p968_p7 = por %p967_p6, %p966_p2 }
  0x50   : > { %p964_p0 = pneg %p963_p9  ;;  %p970_p12 = por %p969_p10, %p968_p7 }
  0x52   : > { %p971_p13 = pnand %p970_p12, %p964_p0 }
  0x54   : > { %974 = shalt.err (!%p971_p13)
}
  0x55   : > { %s975_s18 = scalar_lea.vmem %s1226_s19, %s1213_s5  ;;  %s1080_s22 = smov [#allocation2]  }
  0x56   : > { %p976_p1 = scmp.ne.s32.totalorder %s1226_s19, %s975_s18  ;;  %s979_s21 = sshll.u32 %s1080_s22, 4  ;;  %s980_s21 = int_to_ptr.vmem [resolvable:$false] %s979_s21 }
  0x57   : > { %s981_s24 = scalar_lea.vmem %s980_s21, 9984  ;;  %p982_p8 = scmp.lt.s32.totalorder %s1226_s19, %s980_s21 }
  0x58   : > { %p977_p11 = pnand %p976_p1, %p723_p5  ;;  %p983_p9 = scmp.lt.s32.totalorder %s981_s24, %s975_s18 }
  0x5a   : > { %p978_p4 = pneg %p977_p11  ;;  %p984_p2 = por %p983_p9, %p982_p8 }
  0x5c   : > { %p985_p6 = pnand %p984_p2, %p978_p4 }
  0x5e   : > { %988 = shalt.err (!%p985_p6)
}
  0x5f   : > { %s1081_s6 = smov 384   ;;  %s1082_s7 = smov 24  }
  0x60   : > { %202 = dma.hbm_to_vmem [thread:$0]  (%p723_p5), %s1224_s30, %s1213_s5, %s1226_s19, %s1216_s11, %s1081_s6, %s1081_s6, %s1082_s7  }
  0x61 PF: > { %p1449_p0 = scmp.ne.s32.totalorder %s1446_s29, 0 }
  0x62   : > { %s1256_s8 = sand.u32 (!%p1449_p0), 1, %s1059_s13   ;;  %p1450_p7 = scmp.ne.s32.totalorder (!%p1449_p0), %s1443_s25, 0 }
  0x63   : > { %208 = sbr.rel (%p1449_p0) target bundleno = 441 (0x1b9), region = 32  ;;  %s211_s10 = scalar_lea.sflag (!%p1449_p0), [#allocation3], %s1256_s8 }
  0x64   : > { %s856_s9 = smul.u32 (!%p1449_p0), 312, %s1256_s8 }
  0x66   : > { %s1260_s4 = scalar_lea.vmem (!%p1449_p0), [#allocation2], %s856_s9 }
  0x6a   : > { %1042 = dma.done.wait (%p1450_p7), %s211_s10, 4992  }
  0x6b   : > { %1044 = vsyncadd (%p1450_p7), %s211_s10, 4294962304  ;;  %p1451_p5 = scmp.ne.s32.totalorder %s1442_s23, 0 }
  0x6d   : > { %1046 = dma.done.wait (%p1451_p5), [#allocation6], 6144  }
  0x6e   : > { %1048 = vsyncadd (%p1451_p5), [#allocation6], 4294961152  ;;  %v1083_v0 = vmov 0.0   ;;  %vm1084_vm0 = vmmov 0   ;;  %v335_v1 = vld [vmem:[#allocation5 + $0x80] sm:$0xff]  ;;  %v336_v2 = vld [vmem:[#allocation5 + $0x88] sm:$0xff] }
  0x6f   : > { %810 = vmatprep.subr.bf16.mxu1 %v1083_v0  ;;  %826 = vmatprep.mubr.msk.bf16.mxu1 %vm1084_vm0, %v1083_v0  ;;  %v319_v3 = vld [vmem:[#allocation5] sm:$0xff]  ;;  %v375_v4 = vpack.c.bf16 %v336_v2, %v335_v1  ;;  %v320_v5 = vld [vmem:[#allocation5 + $0x8] sm:$0xff]  ;;  %v337_v10 = vld [vmem:[#allocation5 + $0x90] sm:$0xff]  ;;  %s857_s23 = smul.u32 104, %s1256_s8  ;;  %s588_s11 = scalar_lea.sflag [#allocation4], %s1256_s8 }
  0x70   : > { %v351_v6 = vld [vmem:[#allocation5 + $0x100] sm:$0xff]  ;;  %v352_v7 = vld [vmem:[#allocation5 + $0x108] sm:$0xff]  ;;  %v367_v8 = vpack.c.bf16 %v320_v5, %v319_v3  ;;  %v338_v11 = vld [vmem:[#allocation5 + $0x98] sm:$0xff]  ;;  %p1452_p10 = scmp.ne.s32.totalorder %s1444_s26, 0 }
  0x71   : > { %v383_v9 = vpack.c.bf16 %v352_v7, %v351_v6  ;;  %v321_v12 = vld [vmem:[#allocation5 + $0x10] sm:$0xff]  ;;  %737 = vmatprep.subr.bf16.mxu0 %v375_v4  ;;  %v376_v13 = vpack.c.bf16 %v338_v11, %v337_v10  ;;  %v322_v14 = vld [vmem:[#allocation5 + $0x18] sm:$0xff]  ;;  %v339_v19 = vld [vmem:[#allocation5 + $0xa0] sm:$0xff]  ;;  %s1339_s5 = scalar_lea.vmem [#allocation7], %s857_s23  ;;  %s595_s19 = smul.u32 (%p1452_p10), 13, %s1067_s15 }
  0x72   : > { %v353_v15 = vld [vmem:[#allocation5 + $0x110] sm:$0xff]  ;;  %v354_v16 = vld [vmem:[#allocation5 + $0x118] sm:$0xff]  ;;  %738 = vmatpush3.bf16.msra.mxu0 %v367_v8  ;;  %v368_v17 = vpack.c.bf16 %v322_v14, %v321_v12  ;;  %v340_v20 = vld [vmem:[#allocation5 + $0xa8] sm:$0xff] }
  0x73   : > { %811 = vmatpush3.bf16.msra.mxu1 %v383_v9  ;;  %v384_v18 = vpack.c.bf16 %v354_v16, %v353_v15  ;;  %v323_v21 = vld [vmem:[#allocation5 + $0x20] sm:$0xff]  ;;  %739 = vmatprep.subr.bf16.mxu0 %v376_v13  ;;  %v377_v22 = vpack.c.bf16 %v340_v20, %v339_v19  ;;  %v324_v23 = vld [vmem:[#allocation5 + $0x28] sm:$0xff]  ;;  %v341_v26 = vld [vmem:[#allocation5 + $0xb0] sm:$0xff]  ;;  %s596_s30 = ssub.s32 (%p1452_p10), 25, %s595_s19 }
  0x74   : > { %812 = vmatprep.subr.bf16.mxu1 %v1083_v0  ;;  %v355_v24 = vld [vmem:[#allocation5 + $0x120] sm:$0xff]  ;;  %v356_v25 = vld [vmem:[#allocation5 + $0x128] sm:$0xff]  ;;  %v342_v27 = vld [vmem:[#allocation5 + $0xb8] sm:$0xff]  ;;  %v369_v28 = vpack.c.bf16 %v324_v23, %v323_v21  ;;  %p597_p12 = scmp.lt.s32.totalorder (%p1452_p10), %s596_s30, 13 }
  0x75   : > { %v385_v29 = vpack.c.bf16 %v356_v25, %v355_v24  ;;  %v325_v30 = vld [vmem:[#allocation5 + $0x30] sm:$0xff]  ;;  %v378_v31 = vpack.c.bf16 %v342_v27, %v341_v26  ;;  %v326_v32 = vld [vmem:[#allocation5 + $0x38] sm:$0xff]  ;;  %v343_v35 = vld [vmem:[#allocation5 + $0xc0] sm:$0xff] }
  0x76   : > { %740 = vmatpush3.bf16.msra.mxu0 %v368_v17  ;;  %v357_v33 = vld [vmem:[#allocation5 + $0x130] sm:$0xff]  ;;  %v358_v34 = vld [vmem:[#allocation5 + $0x138] sm:$0xff]  ;;  %v344_v36 = vld [vmem:[#allocation5 + $0xc8] sm:$0xff]  ;;  %v370_v37 = vpack.c.bf16 %v326_v32, %v325_v30 }
  0x77   : > { %813 = vmatpush3.bf16.msra.mxu1 %v384_v18  ;;  %741 = vmatprep.subr.bf16.mxu0 %v377_v22  ;;  %v386_v38 = vpack.c.bf16 %v358_v34, %v357_v33  ;;  %v327_v39 = vld [vmem:[#allocation5 + $0x40] sm:$0xff]  ;;  %v379_v40 = vpack.c.bf16 %v344_v36, %v343_v35  ;;  %v328_v41 = vld [vmem:[#allocation5 + $0x48] sm:$0xff]  ;;  %v345_v44 = vld [vmem:[#allocation5 + $0xd0] sm:$0xff] }
  0x78   : > { %814 = vmatprep.subr.bf16.mxu1 %v1083_v0  ;;  %v359_v42 = vld [vmem:[#allocation5 + $0x140] sm:$0xff]  ;;  %v360_v43 = vld [vmem:[#allocation5 + $0x148] sm:$0xff]  ;;  %v346_v45 = vld [vmem:[#allocation5 + $0xd8] sm:$0xff]  ;;  %v371_v48 = vpack.c.bf16 %v328_v41, %v327_v39 }
  0x79   : > { %v260_v46 = vld [vmem:[%s1260_s4 + $0x8] sm:$0xff]  ;;  %v263_v47 = vld [vmem:[%s1260_s4 + $0x20] sm:$0xff]  ;;  %v387_v49 = vpack.c.bf16 %v360_v43, %v359_v42  ;;  %v380_v52 = vpack.c.bf16 %v346_v45, %v345_v44  ;;  %v347_v56 = vld [vmem:[#allocation5 + $0xe0] sm:$0xff] }
  0x7a   : > { %742 = vmatpush3.bf16.msra.mxu0 %v369_v28  ;;  %v329_v50 = vld [vmem:[#allocation5 + $0x50] sm:$0xff]  ;;  %v299_v51 = vpack.c.bf16 %v263_v47, %v260_v46  ;;  %v330_v53 = vld [vmem:[#allocation5 + $0x58] sm:$0xff]  ;;  %v348_v57 = vld [vmem:[#allocation5 + $0xe8] sm:$0xff] }
  0x7b   : > { %815 = vmatpush3.bf16.msra.mxu1 %v385_v29  ;;  %743 = vmatprep.subr.bf16.mxu0 %v378_v31  ;;  %v361_v54 = vld [vmem:[#allocation5 + $0x150] sm:$0xff]  ;;  %v362_v55 = vld [vmem:[#allocation5 + $0x158] sm:$0xff]  ;;  %v372_v58 = vpack.c.bf16 %v330_v53, %v329_v50  ;;  %v331_v60 = vld [vmem:[#allocation5 + $0x60] sm:$0xff]  ;;  %v381_v61 = vpack.c.bf16 %v348_v57, %v347_v56 }
  0x7c   : > { %816 = vmatprep.subr.bf16.mxu1 %v1083_v0  ;;  %430 = vmatprep.mubr.bf16.mxu0 %v299_v51  ;;  %v388_v59 = vpack.c.bf16 %v362_v55, %v361_v54  ;;  %v332_v62 = vld [vmem:[#allocation5 + $0x68] sm:$0xff]  ;;  %v363_v63 = vld [vmem:[#allocation5 + $0x160] sm:$0xff]  ;;  %v349_v2 = vld [vmem:[#allocation5 + $0xf0] sm:$0xff] }
  0x7d   : > { %v364_v1 = vld [vmem:[#allocation5 + $0x168] sm:$0xff]  ;;  %v350_v3 = vld [vmem:[#allocation5 + $0xf8] sm:$0xff]  ;;  %v373_v4 = vpack.c.bf16 %v332_v62, %v331_v60  ;;  %v333_v6 = vld [vmem:[#allocation5 + $0x70] sm:$0xff] }
  0x7e   : > { %744 = vmatpush3.bf16.msra.mxu0 %v370_v37  ;;  %v389_v5 = vpack.c.bf16 %v364_v1, %v363_v63  ;;  %v382_v7 = vpack.c.bf16 %v350_v3, %v349_v2  ;;  %v334_v8 = vld [vmem:[#allocation5 + $0x78] sm:$0xff]  ;;  %v365_v9 = vld [vmem:[#allocation5 + $0x170] sm:$0xff]  ;;  %v262_v14 = vld [vmem:[%s1260_s4 + $0x18] sm:$0xff] }
  0x7f   : > { %817 = vmatpush3.bf16.msra.mxu1 %v386_v38  ;;  %745 = vmatprep.subr.bf16.mxu0 %v379_v40  ;;  %v366_v10 = vld [vmem:[#allocation5 + $0x178] sm:$0xff]  ;;  %v259_v11 = vld [vmem:[%s1260_s4] sm:$0xff]  ;;  %v374_v12 = vpack.c.bf16 %v334_v8, %v333_v6  ;;  %v266_v17 = vld [vmem:[%s1260_s4 + $0x38] sm:$0xff] }
  0x80   : > { %818 = vmatprep.subr.bf16.mxu1 %v1083_v0  ;;  %v390_v13 = vpack.c.bf16 %v366_v10, %v365_v9  ;;  %v261_v15 = vld [vmem:[%s1260_s4 + $0x10] sm:$0xff]  ;;  %v264_v16 = vld [vmem:[%s1260_s4 + $0x28] sm:$0xff]  ;;  %v298_v19 = vpack.c.bf16 %v262_v14, %v259_v11  ;;  %v267_v24 = vld [vmem:[%s1260_s4 + $0x40] sm:$0xff] }
  0x81   : > { %v269_v18 = vld [vmem:[%s1260_s4 + $0x50] sm:$0xff]  ;;  %v300_v20 = vpack.c.bf16 %v264_v16, %v261_v15  ;;  %v268_v23 = vld [vmem:[%s1260_s4 + $0x48] sm:$0xff]  ;;  %v270_v25 = vld [vmem:[%s1260_s4 + $0x58] sm:$0xff] }
  0x82   : > { %746 = vmatpush3.bf16.msra.mxu0 %v371_v48  ;;  %v302_v21 = vpack.c.bf16 %v269_v18, %v266_v17  ;;  %v265_v22 = vld [vmem:[%s1260_s4 + $0x30] sm:$0xff]  ;;  %v272_v26 = vld [vmem:[%s1260_s4 + $0x68] sm:$0xff]  ;;  %v275_v27 = vld [vmem:[%s1260_s4 + $0x80] sm:$0xff]  ;;  %v303_v29 = vpack.c.bf16 %v270_v25, %v267_v24 }
  0x83   : > { %819 = vmatpush3.bf16.msra.mxu1 %v387_v49  ;;  %747 = vmatprep.subr.bf16.mxu0 %v380_v52  ;;  %v301_v28 = vpack.c.bf16 %v268_v23, %v265_v22  ;;  %v305_v30 = vpack.c.bf16 %v275_v27, %v272_v26  ;;  %v271_v31 = vld [vmem:[%s1260_s4 + $0x60] sm:$0xff]  ;;  %v274_v32 = vld [vmem:[%s1260_s4 + $0x78] sm:$0xff]  ;;  %v273_v33 = vld [vmem:[%s1260_s4 + $0x70] sm:$0xff] }
  0x84   : > { %820 = vmatprep.subr.bf16.mxu1 %v1083_v0  ;;  %v276_v34 = vld [vmem:[%s1260_s4 + $0x88] sm:$0xff]  ;;  %v278_v35 = vld [vmem:[%s1260_s4 + $0x98] sm:$0xff]  ;;  %v281_v36 = vld [vmem:[%s1260_s4 + $0xb0] sm:$0xff]  ;;  %v304_v37 = vpack.c.bf16 %v274_v32, %v271_v31 }
  0x85   : > { %v306_v38 = vpack.c.bf16 %v276_v34, %v273_v33  ;;  %v308_v39 = vpack.c.bf16 %v281_v36, %v278_v35  ;;  %v277_v40 = vld [vmem:[%s1260_s4 + $0x90] sm:$0xff]  ;;  %v280_v41 = vld [vmem:[%s1260_s4 + $0xa8] sm:$0xff]  ;;  %v279_v42 = vld [vmem:[%s1260_s4 + $0xa0] sm:$0xff] }
  0x86   : > { %748 = vmatpush3.bf16.msra.mxu0 %v372_v58  ;;  %v282_v43 = vld [vmem:[%s1260_s4 + $0xb8] sm:$0xff]  ;;  %v284_v44 = vld [vmem:[%s1260_s4 + $0xc8] sm:$0xff]  ;;  %v287_v45 = vld [vmem:[%s1260_s4 + $0xe0] sm:$0xff]  ;;  %v307_v46 = vpack.c.bf16 %v280_v41, %v277_v40 }
  0x87   : > { %821 = vmatpush3.bf16.msra.mxu1 %v388_v59  ;;  %749 = vmatprep.subr.bf16.mxu0 %v381_v61  ;;  %v309_v47 = vpack.c.bf16 %v282_v43, %v279_v42  ;;  %v311_v48 = vpack.c.bf16 %v287_v45, %v284_v44  ;;  %v283_v49 = vld [vmem:[%s1260_s4 + $0xc0] sm:$0xff]  ;;  %v286_v50 = vld [vmem:[%s1260_s4 + $0xd8] sm:$0xff]  ;;  %v285_v51 = vld [vmem:[%s1260_s4 + $0xd0] sm:$0xff] }
  0x88   : > { %822 = vmatprep.subr.bf16.mxu1 %v1083_v0  ;;  %v288_v52 = vld [vmem:[%s1260_s4 + $0xe8] sm:$0xff]  ;;  %v290_v53 = vld [vmem:[%s1260_s4 + $0xf8] sm:$0xff]  ;;  %v293_v54 = vld [vmem:[%s1260_s4 + $0x110] sm:$0xff]  ;;  %v310_v55 = vpack.c.bf16 %v286_v50, %v283_v49 }
  0x89   : > { %v312_v56 = vpack.c.bf16 %v288_v52, %v285_v51  ;;  %v314_v57 = vpack.c.bf16 %v293_v54, %v290_v53  ;;  %v289_v58 = vld [vmem:[%s1260_s4 + $0xf0] sm:$0xff]  ;;  %v292_v59 = vld [vmem:[%s1260_s4 + $0x108] sm:$0xff]  ;;  %v291_v60 = vld [vmem:[%s1260_s4 + $0x100] sm:$0xff] }
  0x8a   : > { %750 = vmatpush3.bf16.msra.mxu0 %v373_v4  ;;  %v294_v61 = vld [vmem:[%s1260_s4 + $0x118] sm:$0xff]  ;;  %v296_v62 = vld [vmem:[%s1260_s4 + $0x128] sm:$0xff]  ;;  %v313_v63 = vpack.c.bf16 %v292_v59, %v289_v58  ;;  %v295_v3 = vld [vmem:[%s1260_s4 + $0x120] sm:$0xff] }
  0x8b   : > { %823 = vmatpush3.bf16.msra.mxu1 %v389_v5  ;;  %751 = vmatprep.subr.bf16.mxu0 %v382_v7  ;;  %v315_v1 = vpack.c.bf16 %v294_v61, %v291_v60  ;;  %v317_v2 = vpack.c.bf16 %v296_v62, %v296_v62  ;;  %v297_v4 = vld [vmem:[%s1260_s4 + $0x130] sm:$0xff]  ;;  %v316_v5 = vpack.c.bf16 %v295_v3, %v295_v3  ;;  %v1335_v10 = vld [vmem:[%s1435_s2] ss:$0 sm:$0xff] }
  0x8c   : > { %824 = vmatprep.subr.bf16.mxu1 %v1083_v0  ;;  %v318_v6 = vpack.c.bf16 %v297_v4, %v297_v4 }
  0x8e   : > { %752 = vmatpush3.bf16.msra.mxu0 %v374_v12 }
  0x8f   : > { %825 = vmatpush3.bf16.msra.mxu1 %v390_v13 }
  0x91   : > { %431 = vmatmul.mubr.bf16.vlgmr.msra.gmra.mrb[0].mxu0 %v298_v19 }
  0x92   : > { %827 = vmatmul.mubr.bf16.vlgmr.msra.gmra.mrb[0].mxu1 %v300_v20  ;;  %438 = vmatprep.mubr.bf16.mxu0 %v302_v21 }
  0x93   : > { %830 = vmatprep.mubr.msk.bf16.mxu1 %vm1084_vm0, %v1083_v0 }
  0x99   : > { %439 = vmatmul.mubr.bf16.gmra.mrb[4].mxu0 %v301_v28 }
  0x9a   : > { %831 = vmatmul.mubr.bf16.gmra.mrb[4].mxu1 %v303_v29  ;;  %446 = vmatprep.mubr.bf16.mxu0 %v305_v30 }
  0x9b   : > { %834 = vmatprep.mubr.msk.bf16.mxu1 %vm1084_vm0, %v1083_v0 }
  0xa1   : > { %447 = vmatmul.mubr.bf16.gmra.mrb[8].mxu0 %v304_v37 }
  0xa2   : > { %835 = vmatmul.mubr.bf16.gmra.mrb[8].mxu1 %v306_v38  ;;  %454 = vmatprep.mubr.bf16.mxu0 %v308_v39 }
  0xa3   : > { %838 = vmatprep.mubr.msk.bf16.mxu1 %vm1084_vm0, %v1083_v0 }
  0xa9   : > { %455 = vmatmul.mubr.bf16.gmra.mrb[12].mxu0 %v307_v46 }
  0xaa   : > { %839 = vmatmul.mubr.bf16.gmra.mrb[12].mxu1 %v309_v47  ;;  %462 = vmatprep.mubr.bf16.mxu0 %v311_v48 }
  0xab   : > { %842 = vmatprep.mubr.msk.bf16.mxu1 %vm1084_vm0, %v1083_v0 }
  0xb1   : > { %463 = vmatmul.mubr.bf16.gmra.mrb[16].mxu0 %v310_v55 }
  0xb2   : > { %843 = vmatmul.mubr.bf16.gmra.mrb[16].mxu1 %v312_v56  ;;  %470 = vmatprep.mubr.bf16.mxu0 %v314_v57 }
  0xb3   : > { %846 = vmatprep.mubr.msk.bf16.mxu1 %vm1084_vm0, %v1083_v0 }
  0xb9   : > { %471 = vmatmul.mubr.bf16.gmra.mrb[20].mxu0 %v313_v63 }
  0xba   : > { %847 = vmatmul.mubr.bf16.gmra.mrb[20].mxu1 %v315_v1  ;;  %478 = vmatprep.mubr.bf16.mxu0 %v317_v2 }
  0xbb   : > { %850 = vmatprep.mubr.msk.bf16.mxu1 %vm1084_vm0, %v1083_v0 }
  0xc1   : > { %479 = vmatmul.mubr.bf16.gmra.mrb[24].mxu0 %v316_v5 }
  0xc2   : > { %851 = vmatmul.mubr.bf16.gmra.mrb[24].mxu1 %v318_v6 }
 0x164   : > { %v753_v7 = vpop.f32.mrb[0].mxu0 }
 0x165   : > { %v520_v8 = vpop.f32.mrb[0].mxu1  ;;  %v754_v9 = vpop.f32.mrb[1].mxu0 }
 0x166   : > { %v828_v11 = vpop.f32.mrb[1].mxu1  ;;  %v755_v12 = vadd.f32 %v754_v9, %v753_v7  ;;  %v756_v13 = vpop.f32.mrb[2].mxu0 }
 0x167   : > { %v523_v14 = vpop.f32.mrb[2].mxu1  ;;  %v757_v15 = vpop.f32.mrb[3].mxu0 }
 0x168   : > { %v829_v0 = vpop.f32.mrb[3].mxu1  ;;  %v433_v16 = vadd.f32 %v755_v12, %v1335_v10  ;;  %v758_v17 = vadd.f32 %v757_v15, %v756_v13 }
 0x16a   : > { %v521_v18 = vadd.f32 %v520_v8, %v433_v16  ;;  %v436_v19 = vadd.f32 %v758_v17, %v1335_v10 }
 0x16c   : > { %574 = vst [vmem:[%s1339_s5] sm:$0xff] %v521_v18  ;;  %v524_v20 = vadd.f32 %v523_v14, %v436_v19  ;;  %v759_v21 = vpop.f32.mrb[4].mxu0 }
 0x16d   : > { %v528_v22 = vpop.f32.mrb[4].mxu1  ;;  %v760_v23 = vpop.f32.mrb[5].mxu0 }
 0x16e   : > { %v832_v24 = vpop.f32.mrb[5].mxu1  ;;  %575 = vst [vmem:[%s1339_s5 + $0x8] sm:$0xff] %v524_v20  ;;  %v761_v25 = vadd.f32 %v760_v23, %v759_v21  ;;  %v762_v26 = vpop.f32.mrb[6].mxu0 }
 0x16f   : > { %v531_v27 = vpop.f32.mrb[6].mxu1  ;;  %v763_v28 = vpop.f32.mrb[7].mxu0 }
 0x170   : > { %v833_v29 = vpop.f32.mrb[7].mxu1  ;;  %v441_v30 = vadd.f32 %v761_v25, %v1335_v10  ;;  %v764_v31 = vadd.f32 %v763_v28, %v762_v26 }
 0x172   : > { %v529_v32 = vadd.f32 %v528_v22, %v441_v30  ;;  %v444_v33 = vadd.f32 %v764_v31, %v1335_v10 }
 0x174   : > { %576 = vst [vmem:[%s1339_s5 + $0x10] sm:$0xff] %v529_v32  ;;  %v532_v34 = vadd.f32 %v531_v27, %v444_v33  ;;  %v765_v35 = vpop.f32.mrb[8].mxu0 }
 0x175   : > { %v536_v36 = vpop.f32.mrb[8].mxu1  ;;  %v766_v37 = vpop.f32.mrb[9].mxu0 }
 0x176   : > { %v836_v38 = vpop.f32.mrb[9].mxu1  ;;  %577 = vst [vmem:[%s1339_s5 + $0x18] sm:$0xff] %v532_v34  ;;  %v767_v39 = vadd.f32 %v766_v37, %v765_v35  ;;  %v768_v40 = vpop.f32.mrb[10].mxu0 }
 0x177   : > { %v539_v41 = vpop.f32.mrb[10].mxu1  ;;  %v769_v42 = vpop.f32.mrb[11].mxu0 }
 0x178   : > { %v837_v43 = vpop.f32.mrb[11].mxu1  ;;  %v449_v44 = vadd.f32 %v767_v39, %v1335_v10  ;;  %v770_v45 = vadd.f32 %v769_v42, %v768_v40 }
 0x17a   : > { %v537_v46 = vadd.f32 %v536_v36, %v449_v44  ;;  %v452_v47 = vadd.f32 %v770_v45, %v1335_v10 }
 0x17c   : > { %578 = vst [vmem:[%s1339_s5 + $0x20] sm:$0xff] %v537_v46  ;;  %v540_v48 = vadd.f32 %v539_v41, %v452_v47  ;;  %v771_v49 = vpop.f32.mrb[12].mxu0 }
 0x17d   : > { %v544_v50 = vpop.f32.mrb[12].mxu1  ;;  %v772_v51 = vpop.f32.mrb[13].mxu0 }
 0x17e   : > { %v840_v52 = vpop.f32.mrb[13].mxu1  ;;  %579 = vst [vmem:[%s1339_s5 + $0x28] sm:$0xff] %v540_v48  ;;  %v773_v53 = vadd.f32 %v772_v51, %v771_v49  ;;  %v774_v54 = vpop.f32.mrb[14].mxu0 }
 0x17f   : > { %v547_v55 = vpop.f32.mrb[14].mxu1  ;;  %v775_v56 = vpop.f32.mrb[15].mxu0 }
 0x180   : > { %v841_v57 = vpop.f32.mrb[15].mxu1  ;;  %v457_v58 = vadd.f32 %v773_v53, %v1335_v10  ;;  %v776_v59 = vadd.f32 %v775_v56, %v774_v54 }
 0x182   : > { %v545_v60 = vadd.f32 %v544_v50, %v457_v58  ;;  %v460_v61 = vadd.f32 %v776_v59, %v1335_v10 }
 0x184   : > { %580 = vst [vmem:[%s1339_s5 + $0x30] sm:$0xff] %v545_v60  ;;  %v548_v62 = vadd.f32 %v547_v55, %v460_v61  ;;  %v777_v63 = vpop.f32.mrb[16].mxu0 }
 0x185   : > { %v552_v1 = vpop.f32.mrb[16].mxu1  ;;  %v778_v2 = vpop.f32.mrb[17].mxu0 }
 0x186   : > { %v844_v3 = vpop.f32.mrb[17].mxu1  ;;  %581 = vst [vmem:[%s1339_s5 + $0x38] sm:$0xff] %v548_v62  ;;  %v779_v4 = vadd.f32 %v778_v2, %v777_v63  ;;  %v780_v5 = vpop.f32.mrb[18].mxu0 }
 0x187   : > { %v555_v6 = vpop.f32.mrb[18].mxu1  ;;  %v781_v7 = vpop.f32.mrb[19].mxu0 }
 0x188   : > { %v845_v8 = vpop.f32.mrb[19].mxu1  ;;  %v465_v9 = vadd.f32 %v779_v4, %v1335_v10  ;;  %v782_v11 = vadd.f32 %v781_v7, %v780_v5 }
 0x18a   : > { %v553_v12 = vadd.f32 %v552_v1, %v465_v9  ;;  %v468_v13 = vadd.f32 %v782_v11, %v1335_v10 }
 0x18c   : > { %582 = vst [vmem:[%s1339_s5 + $0x40] sm:$0xff] %v553_v12  ;;  %v556_v14 = vadd.f32 %v555_v6, %v468_v13  ;;  %v783_v15 = vpop.f32.mrb[20].mxu0 }
 0x18d   : > { %v560_v0 = vpop.f32.mrb[20].mxu1  ;;  %v784_v16 = vpop.f32.mrb[21].mxu0 }
 0x18e   : > { %v848_v17 = vpop.f32.mrb[21].mxu1  ;;  %583 = vst [vmem:[%s1339_s5 + $0x48] sm:$0xff] %v556_v14  ;;  %v785_v18 = vadd.f32 %v784_v16, %v783_v15  ;;  %v786_v19 = vpop.f32.mrb[22].mxu0 }
 0x18f   : > { %v563_v20 = vpop.f32.mrb[22].mxu1  ;;  %v787_v21 = vpop.f32.mrb[23].mxu0 }
 0x190   : > { %v849_v22 = vpop.f32.mrb[23].mxu1  ;;  %v473_v23 = vadd.f32 %v785_v18, %v1335_v10  ;;  %v788_v24 = vadd.f32 %v787_v21, %v786_v19 }
 0x192   : > { %v561_v25 = vadd.f32 %v560_v0, %v473_v23  ;;  %v476_v26 = vadd.f32 %v788_v24, %v1335_v10 }
 0x194   : > { %584 = vst [vmem:[%s1339_s5 + $0x50] sm:$0xff] %v561_v25  ;;  %v564_v27 = vadd.f32 %v563_v20, %v476_v26  ;;  %v789_v28 = vpop.f32.mrb[24].mxu0 }
 0x195   : > { %v568_v29 = vpop.f32.mrb[24].mxu1  ;;  %v790_v30 = vpop.f32.mrb[25].mxu0 }
 0x196   : > { %v852_v31 = vpop.f32.mrb[25].mxu1  ;;  %585 = vst [vmem:[%s1339_s5 + $0x58] sm:$0xff] %v564_v27  ;;  %v791_v32 = vadd.f32 %v790_v30, %v789_v28  ;;  %v792_v33 = vpop.f32.mrb[26].mxu0  ;;  %594 = sbr.rel (!%p1452_p10) target bundleno = 441 (0x1b9), region = 44 }
 0x197   : > { %v571_v34 = vpop.f32.mrb[26].mxu1  ;;  %v793_v35 = vpop.f32.mrb[27].mxu0 }
 0x198   : > { %v853_v36 = vpop.f32.mrb[27].mxu1  ;;  %v481_v37 = vadd.f32 %v791_v32, %v1335_v10 }
 0x19a   : > { %v569_v38 = vadd.f32 %v568_v29, %v481_v37 }
 0x19c   : > { %586 = vst [vmem:[%s1339_s5 + $0x60] sm:$0xff] %v569_v38 }
 0x19d   : > { %s1464_s30 = smov (!%p597_p12, %s596_s30), 13 }
 0x19e   : > { %s1369_s18 = sshll.u32 %s1464_s30, 7 }
 0x19f   : > { %s601_s22 = ssub.s32 1664, %s1369_s18 }
 0x1a0   : > { %602 = vsyncadd %s588_s11, %s601_s22  ;;  %p730_p13 = scmp.ne.s32.totalorder %s1369_s18, 0  ;;  %s736_s26 = smul.u32 1664, %s1067_s15 }
 0x1a1   : > { %s608_s21 = sshll.u32 %s1339_s5, 4  ;;  %s1085_s10 = smov [#allocation7]   ;;  %s1382_s21 = int_to_ptr.vmem [resolvable:$true] %s608_s21 }
 0x1a2   : > { %s1380_s7 = scalar_lea.hbm %s1436_s3, %s736_s26  ;;  %s989_s9 = scalar_lea.vmem %s1382_s21, %s1369_s18 }
 0x1a3   : > { %p990_p1 = scmp.ne.s32.totalorder %s1382_s21, %s989_s9  ;;  %s993_s4 = sshll.u32 %s1085_s10, 4  ;;  %s994_s4 = int_to_ptr.vmem [resolvable:$false] %s993_s4 }
 0x1a4   : > { %s995_s15 = scalar_lea.vmem %s994_s4, 3328  ;;  %p996_p8 = scmp.lt.s32.totalorder %s1382_s21, %s994_s4 }
 0x1a5   : > { %p991_p11 = pnand %p990_p1, %p730_p13  ;;  %p997_p9 = scmp.lt.s32.totalorder %s995_s15, %s989_s9 }
 0x1a7   : > { %p992_p4 = pneg %p991_p11  ;;  %p998_p2 = por %p997_p9, %p996_p8 }
 0x1a9   : > { %p999_p6 = pnand %p998_p2, %p992_p4 }
 0x1ab   : > { %1002 = shalt.err (!%p999_p6)
}
 0x1ac   : > { %s1003_s23 = scalar_lea.hbm %s1380_s7, %s1369_s18  ;;  %s1007_s5 = scalar_lea.hbm %s1436_s3, 3200 }
 0x1ad   : > { %p1004_p0 = scmp.ne.s32.totalorder %s1380_s7, %s1003_s23  ;;  %p1008_p10 = scmp.lt.u32.totalorder %s1380_s7, %s1436_s3 }
 0x1ae   : > { %p1009_p12 = scmp.lt.u32.totalorder %s1007_s5, %s1003_s23  ;;  %p1011_p11 = scmp.lt.u32.totalorder %s1003_s23, %s1380_s7 }
 0x1af   : > { %p1005_p7 = pnand %p1004_p0, %p730_p13 }
 0x1b0   : > { %p1010_p1 = por %p1009_p12, %p1008_p10 }
 0x1b1   : > { %p1006_p5 = pneg %p1005_p7 }
 0x1b2   : > { %p1012_p4 = por %p1011_p11, %p1010_p1 }
 0x1b4   : > { %p1013_p8 = pnand %p1012_p4, %p1006_p5 }
 0x1b6   : > { %1016 = shalt.err (!%p1013_p8)
}
 0x1b7   : > { %s1086_s22 = smov 128   ;;  %s1087_s26 = smov 8  }
 0x1b8   : > { %614 = dma.vmem_to_hbm [thread:$0]  (%p730_p13), %s1382_s21, %s1369_s18, %s1380_s7, %s588_s11, %s1086_s22, %s1086_s22, %s1087_s26  }
 0x1b9 PF: > { %s623_s24 = sand.u32 1, %s1055_s12   ;;  %p1453_p9 = scmp.ne.s32.totalorder %s1445_s28, 0 }
 0x1ba   : > { %s624_s6 = scalar_lea.sflag [#allocation4], %s623_s24 }
 0x1bb   : > { %p869_p2 = pnand %p720_p3, %p1453_p9 }
 0x1bd   : > { %1050 = dma.done.wait (!%p869_p2), %s624_s6, 1664  }
 0x1be   : > { %1052 = vsyncadd (!%p869_p2), %s624_s6, 4294965632  ;;  %s20_s17 = sadd.s32 1, %s1075_s17   ;;  %s1454_s12 = smov %s1059_s13 }
 0x1bf   : > { %p17_p6 = scmp.ge.s32.totalorder %s20_s17, 4   ;;  %s1455_s13 = smov %s1063_s14 }
 0x1c0   : > { %s1456_s14 = smov %s1170_s27  ;;  %s1457_s15 = smov %s1071_s16 }
 0x1c1   : > { %s1458_s16 = smov %s1460_s20  ;;  %19 = sbr.rel (!%p17_p6) target bundleno = 7 (0x7), region = 85 }
 0x1c8   :  { %629 = vsyncpa [#allocation3], 1 }
 0x1c9   :  { %631 = vsyncpa [#allocation3 + $0x1], 1 }
 0x1ca   :  { %632 = vsyncpa [#allocation6], 1 }
 0x1cb   :  { %633 = vsyncpa [#allocation4], 1 }
 0x1cc   :  { %635 = vsyncpa [#allocation4 + $0x1], 1 }

</bundles_post_ra>
